<compile_context>
chip_gen: v6e
topology: v6e:2x2x1
jax: 0.10.0
libtpu: 0.0.40
codegen_flags: <defaults>
</compile_context>

<pallas_src>
import functools

import jax
import jax.numpy as jnp
from jax.experimental import pallas as pl
from jax.experimental.pallas import tpu as pltpu

EPS = 1e-12


# ---------------------------------------------------------------------------
# Fused kernel: spectral-norm power iteration + conv2d ('same', stride 1)
# ---------------------------------------------------------------------------
def _sn_conv_kernel(w2d_ref, w_conv_ref, u_ref, v_ref, x_ref, b_ref,
                    out_ref, u_out_ref, v_out_ref, slab_ref, *,
                    power_iterations, h_img, w_img, kh, kw):
    """
    Grid: (N,) — one image per step ("parallel": megacore-shardable on v7x).

    w2d_ref   : (Cout, K)   weight viewed 2-D, PyTorch column order (cin,i,j)
    w_conv_ref: (Cout, K)   same weight, column order (i,j,cin) = slab rows
    u_ref     : (Cout, 1)   power-iteration left vector
    v_ref     : (1, K)      power-iteration right vector
    x_ref     : (Cin, M)    this image, channel-major, M = H*W
    b_ref     : (Cout, 1)   bias
    out_ref   : (Cout, M)   lane-dense conv output for this image
    u_out_ref : (Cout, 1)   updated u (identical every step; wrapper reads n=0)
    v_out_ref : (1, K)      updated v (identical every step; wrapper reads n=0)
    slab_ref  : (K, M) f32  VMEM scratch: im2col slab, row = tap*Cin + cin
    """
    # ---- 1. power iteration: VPU broadcast-mul + XLU reduce (no MXU). -----
    # Recomputed per grid step (8x36 -> negligible) so the grid axis can be
    # "parallel" without sharing sigma across TensorCores.
    w2 = w2d_ref[...]                                    # (Cout, K)
    u = u_ref[...]                                       # (Cout, 1)
    v = v_ref[...]                                       # (1, K)
    wv = None
    for _ in range(power_iterations):
        wtu = jnp.sum(w2 * u, axis=0, keepdims=True)     # W^T u : (1, K)
        v = wtu / (jnp.sqrt(jnp.sum(wtu * wtu)) + EPS)   # l2normalize
        wv = jnp.sum(w2 * v, axis=1, keepdims=True)      # W v   : (Cout, 1)
        u = wv / (jnp.sqrt(jnp.sum(wv * wv)) + EPS)
    if wv is None:                                       # power_iterations == 0
        wv = jnp.sum(w2 * v, axis=1, keepdims=True)
    sigma = jnp.sum(u * wv)        # u.(W v), reusing last iteration's W v
    inv_sigma = 1.0 / sigma        # exact; no eps on sigma (matches PyTorch)
    u_out_ref[...] = u
    v_out_ref[...] = v

    # ---- 2. im2col slab + ONE (Cout,K)@(K,M) MXU matmul. ------------------
    cin, m = x_ref.shape
    pad_h, pad_w = kh // 2, kw // 2
    x = x_ref[...]                                       # (Cin, M)

    lane = jax.lax.broadcasted_iota(jnp.int32, (1, m), 1)  # flat index h*W + w
    if (w_img & (w_img - 1)) == 0:                         # power-of-two W
        w_pos = lane & (w_img - 1)
        h_pos = lane >> (w_img.bit_length() - 1)           # < H since m = H*W
    else:
        w_pos = lane % w_img
        h_pos = lane // w_img

    # Border predicates built once, memoized across the unrolled tap loop.
    h_masks = {0: None}
    w_masks = {0: None}

    for t in range(kh * kw):
        di = t // kw - pad_h
        dj = t % kw - pad_w
        if di not in h_masks:
            h_masks[di] = (h_pos >= -di) if di < 0 else (h_pos < h_img - di)
        if dj not in w_masks:
            w_masks[dj] = (w_pos >= -dj) if dj < 0 else (w_pos < w_img - dj)
        # shifted[m] = x[:, (m + s) % M]; lanes that wrap are exactly the
        # out-of-image border lanes and are zeroed by the masks below
        # (valid because stride == 1 and kh//2 < H, kw//2 < W).
        s = di * w_img + dj
        xs = x if s == 0 else pltpu.roll(x, shift=(-s) % m, axis=1)
        hm, wm = h_masks[di], w_masks[dj]
        if hm is not None and wm is not None:
            valid = jnp.logical_and(hm, wm)
        else:
            valid = hm if hm is not None else wm
        if valid is not None:
            xs = jnp.where(valid, xs, 0.0)                 # zero padding
        slab_ref[t * cin:(t + 1) * cin, :] = xs            # static offsets

    acc = jnp.dot(w_conv_ref[...], slab_ref[...],
                  preferred_element_type=jnp.float32)      # single MXU push
    # Epilogue: scale by 1/sigma (== conv with W/sigma) and add bias.
    out_ref[...] = acc * inv_sigma + b_ref[...]


@functools.partial(jax.jit, static_argnames=("power_iterations",))
def spectral_norm_conv2d(x, weight, bias, u, v, power_iterations=1):
    """x: (N,Cin,H,W); weight: (Cout,Cin,kh,kw); stride 1, 'same' padding.

    Returns (y in NCHW, u_new, v_new)."""
    N, Cin, H, W = x.shape
    Cout, Cin_w, kh, kw = weight.shape
    assert Cin == Cin_w
    # roll+mask im2col is only valid for stride-1 'same' conv with pad < H, W.
    assert kh // 2 < H and kw // 2 < W
    K = Cin * kh * kw
    M = H * W          # per-image lane extent; 256 here -> lane-dense (2x128)

    w2d = weight.reshape(Cout, K).astype(jnp.float32)        # (cin,i,j) cols
    w_conv = (weight.transpose(0, 2, 3, 1)                   # (Cout,kh,kw,Cin)
              .reshape(Cout, K).astype(jnp.float32))         # (i,j,cin) cols
    u_col = u.reshape(Cout, 1).astype(jnp.float32)
    v_row = v.reshape(1, K).astype(jnp.float32)
    b_col = bias.reshape(Cout, 1).astype(jnp.float32)

    # Free reshape of contiguous NCHW — no wrapper transpose / HBM round trip.
    x3 = x.astype(jnp.float32).reshape(N, Cin, M)

    kernel = functools.partial(_sn_conv_kernel,
                               power_iterations=power_iterations,
                               h_img=H, w_img=W, kh=kh, kw=kw)

    out, u_out, v_out = pl.pallas_call(
        kernel,
        out_shape=(jax.ShapeDtypeStruct((N, Cout, M), jnp.float32),
                   jax.ShapeDtypeStruct((N, Cout, 1), jnp.float32),
                   jax.ShapeDtypeStruct((N, 1, K), jnp.float32)),
        grid=(N,),
        in_specs=[pl.BlockSpec((Cout, K), lambda n: (0, 0)),
                  pl.BlockSpec((Cout, K), lambda n: (0, 0)),
                  pl.BlockSpec((Cout, 1), lambda n: (0, 0)),
                  pl.BlockSpec((1, K), lambda n: (0, 0)),
                  pl.BlockSpec((None, Cin, M), lambda n: (n, 0, 0)),
                  pl.BlockSpec((Cout, 1), lambda n: (0, 0))],
        out_specs=(pl.BlockSpec((None, Cout, M), lambda n: (n, 0, 0)),
                   pl.BlockSpec((None, Cout, 1), lambda n: (n, 0, 0)),
                   pl.BlockSpec((None, 1, K), lambda n: (n, 0, 0))),
        scratch_shapes=[pltpu.VMEM((K, M), jnp.float32)],     # im2col slab
        compiler_params=pltpu.CompilerParams(
            dimension_semantics=("parallel",)),
    )(w2d, w_conv, u_col, v_row, x3, b_col)

    y = out.reshape(N, Cout, H, W)            # free reshape, already NCHW
    return y, u_out[0, :, 0], v_out[0, 0, :]


# ---------------------------------------------------------------------------
# SpectralNorm(Conv2d) module
# ---------------------------------------------------------------------------
class SpectralNormConv2d:
    """JAX/Pallas equivalent of SpectralNorm(nn.Conv2d(cin, cout, k, padding=k//2))."""

    def __init__(self, key, in_ch, out_ch, k=3, power_iterations=1):
        kw_, kb_, ku_, kv_ = jax.random.split(key, 4)
        # weight_bar / bias / u / v — deterministic synthetic init.
        self.weight_bar = 0.1 * jax.random.normal(kw_, (out_ch, in_ch, k, k), jnp.float32)
        self.bias = 0.1 * jax.random.normal(kb_, (out_ch,), jnp.float32)
        height = out_ch
        width = in_ch * k * k
        u = jax.random.normal(ku_, (height,), jnp.float32)
        v = jax.random.normal(kv_, (width,), jnp.float32)
        self.u = u / (jnp.linalg.norm(u) + EPS)   # _make_params l2normalizes u, v
        self.v = v / (jnp.linalg.norm(v) + EPS)
        self.power_iterations = power_iterations

    def __call__(self, x):
        y, u_new, v_new = spectral_norm_conv2d(
            x, self.weight_bar, self.bias, self.u, self.v,
            power_iterations=self.power_iterations)
        # PyTorch updates the u/v buffers in place during forward; mirror that.
        self.u, self.v = u_new, v_new
        return y


# ---------------------------------------------------------------------------
if __name__ == "__main__":
    key = jax.random.PRNGKey(0)
    k_mod, k_x = jax.random.split(key)

    N, Cin, H, W = 2, 4, 16, 16
    Cout, ksz = 8, 3

    module = SpectralNormConv2d(k_mod, Cin, Cout, k=ksz, power_iterations=1)
    x = jax.random.normal(k_x, (N, Cin, H, W), jnp.float32)

    u0, v0 = module.u, module.v            # buffers before the in-place update
    y = module(x)
    y = jax.block_until_ready(y)
    assert y.shape == (N, Cout, H, W)

    # Plain-JAX reference for the same forward (power iteration + conv).
    w2d = module.weight_bar.reshape(Cout, -1)
    u_ref, v_ref = u0, v0
    for _ in range(module.power_iterations):
        v_ref = w2d.T @ u_ref
        v_ref = v_ref / (jnp.linalg.norm(v_ref) + EPS)
        u_ref = w2d @ v_ref
        u_ref = u_ref / (jnp.linalg.norm(u_ref) + EPS)
    sigma = u_ref @ (w2d @ v_ref)
    w_sn_ref = (w2d / sigma).reshape(module.weight_bar.shape)
    y_ref = jax.lax.conv_general_dilated(
        x, w_sn_ref, window_strides=(1, 1), padding="SAME",
        dimension_numbers=("NCHW", "OIHW", "NCHW"))
    y_ref = y_ref + module.bias.reshape(1, Cout, 1, 1)
    assert jnp.allclose(y, y_ref, atol=1e-4, rtol=1e-4)
    # Updated power-iteration buffers must match too.
    assert jnp.allclose(module.u, u_ref, atol=1e-4, rtol=1e-4)
    assert jnp.allclose(module.v, v_ref, atol=1e-4, rtol=1e-4)

    print("KERNEL_OK")
</pallas_src>

<mosaic_0001>
module attributes {stable_mosaic.version = 11 : i64} {
  func.func @_sn_conv_kernel(%arg0: i32, %arg1: memref<8x36xf32, #tpu.memory_space<vmem>>, %arg2: memref<8x36xf32, #tpu.memory_space<vmem>>, %arg3: memref<8x1xf32, #tpu.memory_space<vmem>>, %arg4: memref<1x36xf32, #tpu.memory_space<vmem>>, %arg5: memref<1x4x256xf32, #tpu.memory_space<vmem>>, %arg6: memref<8x1xf32, #tpu.memory_space<vmem>>, %arg7: memref<1x8x256xf32, #tpu.memory_space<vmem>>, %arg8: memref<1x8x1xf32, #tpu.memory_space<vmem>>, %arg9: memref<1x1x36xf32, #tpu.memory_space<vmem>>, %arg10: memref<36x256xf32, #tpu.memory_space<vmem>>) attributes {dimension_semantics = [#tpu.dimension_semantics<parallel>], iteration_bounds = array<i64: 2>, scalar_prefetch = 0 : i64, scratch_operands = 1 : i64, tpu.core_type = #tpu.core_type<tc>, window_params = [{pipeline_mode = #tpu.pipeline_mode<synchronous>, transform_indices = @transform_0, window_bounds = array<i64: 8, 36>}, {pipeline_mode = #tpu.pipeline_mode<synchronous>, transform_indices = @transform_1, window_bounds = array<i64: 8, 36>}, {pipeline_mode = #tpu.pipeline_mode<synchronous>, transform_indices = @transform_2, window_bounds = array<i64: 8, 1>}, {pipeline_mode = #tpu.pipeline_mode<synchronous>, transform_indices = @transform_3, window_bounds = array<i64: 1, 36>}, {transform_indices = @transform_4, window_bounds = array<i64: 1, 4, 256>}, {pipeline_mode = #tpu.pipeline_mode<synchronous>, transform_indices = @transform_5, window_bounds = array<i64: 8, 1>}, {transform_indices = @transform_6, window_bounds = array<i64: 1, 8, 256>}, {transform_indices = @transform_7, window_bounds = array<i64: 1, 8, 1>}, {transform_indices = @transform_8, window_bounds = array<i64: 1, 1, 36>}]} {
    %c0 = arith.constant 0 : index
    %c0_0 = arith.constant 0 : index
    %0 = vector.load %arg1[%c0, %c0_0] : memref<8x36xf32, #tpu.memory_space<vmem>>, vector<8x36xf32>
    %c0_1 = arith.constant 0 : index
    %c0_2 = arith.constant 0 : index
    %1 = vector.load %arg3[%c0_1, %c0_2] : memref<8x1xf32, #tpu.memory_space<vmem>>, vector<8x1xf32>
    %2 = vector.broadcast %1 : vector<8x1xf32> to vector<8x36xf32>
    %3 = arith.mulf %0, %2 : vector<8x36xf32>
    %cst = arith.constant dense<0.000000e+00> : vector<36xf32>
    %4 = vector.multi_reduction <add>, %3, %cst [0] : vector<8x36xf32> to vector<36xf32>
    %5 = vector.shape_cast %4 : vector<36xf32> to vector<1x36xf32>
    %6 = arith.mulf %5, %5 : vector<1x36xf32>
    %7 = vector.shape_cast %6 : vector<1x36xf32> to vector<1x1x36xf32>
    %cst_3 = arith.constant dense<0.000000e+00> : vector<1xf32>
    %8 = vector.multi_reduction <add>, %7, %cst_3 [1, 2] : vector<1x1x36xf32> to vector<1xf32>
    %9 = vector.shape_cast %8 : vector<1xf32> to vector<1x1x1xf32>
    %10 = vector.extract %9[0, 0, 0] : f32 from vector<1x1x1xf32>
    %11 = math.sqrt %10 : f32
    %cst_4 = arith.constant 9.99999996E-13 : f32
    %12 = arith.addf %11, %cst_4 : f32
    %13 = vector.broadcast %12 : f32 to vector<1x36xf32>
    %14 = arith.divf %5, %13 : vector<1x36xf32>
    %15 = vector.broadcast %14 : vector<1x36xf32> to vector<8x36xf32>
    %16 = arith.mulf %0, %15 : vector<8x36xf32>
    %cst_5 = arith.constant dense<0.000000e+00> : vector<8xf32>
    %17 = vector.multi_reduction <add>, %16, %cst_5 [1] : vector<8x36xf32> to vector<8xf32>
    %18 = vector.shape_cast %17 : vector<8xf32> to vector<8x1xf32>
    %19 = arith.mulf %18, %18 : vector<8x1xf32>
    %20 = vector.shape_cast %19 : vector<8x1xf32> to vector<1x8x1xf32>
    %cst_6 = arith.constant dense<0.000000e+00> : vector<1xf32>
    %21 = vector.multi_reduction <add>, %20, %cst_6 [1, 2] : vector<1x8x1xf32> to vector<1xf32>
    %22 = vector.shape_cast %21 : vector<1xf32> to vector<1x1x1xf32>
    %23 = vector.extract %22[0, 0, 0] : f32 from vector<1x1x1xf32>
    %24 = math.sqrt %23 : f32
    %cst_7 = arith.constant 9.99999996E-13 : f32
    %25 = arith.addf %24, %cst_7 : f32
    %26 = vector.broadcast %25 : f32 to vector<8x1xf32>
    %27 = arith.divf %18, %26 : vector<8x1xf32>
    %28 = arith.mulf %27, %18 : vector<8x1xf32>
    %29 = vector.shape_cast %28 : vector<8x1xf32> to vector<1x8x1xf32>
    %cst_8 = arith.constant dense<0.000000e+00> : vector<1xf32>
    %30 = vector.multi_reduction <add>, %29, %cst_8 [1, 2] : vector<1x8x1xf32> to vector<1xf32>
    %31 = vector.shape_cast %30 : vector<1xf32> to vector<1x1x1xf32>
    %32 = vector.extract %31[0, 0, 0] : f32 from vector<1x1x1xf32>
    %cst_9 = arith.constant 1.000000e+00 : f32
    %33 = arith.divf %cst_9, %32 : f32
    %c0_10 = arith.constant 0 : index
    %c0_11 = arith.constant 0 : index
    %c0_12 = arith.constant 0 : index
    %34 = vector.load %arg8[%c0_10, %c0_11, %c0_12] : memref<1x8x1xf32, #tpu.memory_space<vmem>>, vector<1x8x1xf32>
    %35 = vector.shape_cast %34 : vector<1x8x1xf32> to vector<8x1xf32>
    %36 = vector.shape_cast %27 : vector<8x1xf32> to vector<1x8x1xf32>
    tpu.vector_store %arg8[%c0_10, %c0_11, %c0_12], %36 {strides = array<i32>} : memref<1x8x1xf32, #tpu.memory_space<vmem>>, vector<1x8x1xf32>,
    %c0_13 = arith.constant 0 : index
    %c0_14 = arith.constant 0 : index
    %c0_15 = arith.constant 0 : index
    %37 = vector.load %arg9[%c0_13, %c0_14, %c0_15] : memref<1x1x36xf32, #tpu.memory_space<vmem>>, vector<1x1x36xf32>
    %38 = vector.shape_cast %37 : vector<1x1x36xf32> to vector<1x36xf32>
    %39 = vector.shape_cast %14 : vector<1x36xf32> to vector<1x1x36xf32>
    tpu.vector_store %arg9[%c0_13, %c0_14, %c0_15], %39 {strides = array<i32>} : memref<1x1x36xf32, #tpu.memory_space<vmem>>, vector<1x1x36xf32>,
    %c0_16 = arith.constant 0 : index
    %c0_17 = arith.constant 0 : index
    %c0_18 = arith.constant 0 : index
    %40 = vector.load %arg5[%c0_16, %c0_17, %c0_18] : memref<1x4x256xf32, #tpu.memory_space<vmem>>, vector<1x4x256xf32>
    %41 = vector.shape_cast %40 : vector<1x4x256xf32> to vector<4x256xf32>
    %42 = tpu.iota {dimensions = array<i32: 1>} : vector<1x256xi32>
    %c15_i32 = arith.constant 15 : i32
    %43 = vector.broadcast %c15_i32 : i32 to vector<1x256xi32>
    %44 = arith.andi %42, %43 : vector<1x256xi32>
    %c4_i32 = arith.constant 4 : i32
    %45 = vector.broadcast %c4_i32 : i32 to vector<1x256xi32>
    %46 = arith.shrsi %42, %45 : vector<1x256xi32>
    %c1_i32 = arith.constant 1 : i32
    %47 = vector.broadcast %c1_i32 : i32 to vector<1x256xi32>
    %48 = arith.cmpi sge, %46, %47 : vector<1x256xi32>
    %c1_i32_19 = arith.constant 1 : i32
    %49 = vector.broadcast %c1_i32_19 : i32 to vector<1x256xi32>
    %50 = arith.cmpi sge, %44, %49 : vector<1x256xi32>
    %c17_i32 = arith.constant 17 : i32
    %51 = tpu.dynamic_rotate %41 by %c17_i32 dim 1 : vector<4x256xf32>, i32 -> vector<4x256xf32>
    %52 = arith.andi %48, %50 : vector<1x256xi1>
    %cst_20 = arith.constant 0.000000e+00 : f32
    %53 = vector.shape_cast %52 : vector<1x256xi1> to vector<1x256xi1>
    %54 = vector.broadcast %53 : vector<1x256xi1> to vector<4x256xi1>
    %55 = vector.broadcast %cst_20 : f32 to vector<4x256xf32>
    %56 = arith.select %54, %51, %55 : vector<4x256xi1>, vector<4x256xf32>
    %c0_21 = arith.constant 0 : index
    %c0_22 = arith.constant 0 : index
    %57 = vector.load %arg10[%c0_21, %c0_22] : memref<36x256xf32, #tpu.memory_space<vmem>>, vector<4x256xf32>
    tpu.vector_store %arg10[%c0_21, %c0_22], %56 {strides = array<i32>} : memref<36x256xf32, #tpu.memory_space<vmem>>, vector<4x256xf32>,
    %c16_i32 = arith.constant 16 : i32
    %58 = tpu.dynamic_rotate %41 by %c16_i32 dim 1 : vector<4x256xf32>, i32 -> vector<4x256xf32>
    %cst_23 = arith.constant 0.000000e+00 : f32
    %59 = vector.shape_cast %48 : vector<1x256xi1> to vector<1x256xi1>
    %60 = vector.broadcast %59 : vector<1x256xi1> to vector<4x256xi1>
    %61 = vector.broadcast %cst_23 : f32 to vector<4x256xf32>
    %62 = arith.select %60, %58, %61 : vector<4x256xi1>, vector<4x256xf32>
    %c4 = arith.constant 4 : index
    %c0_24 = arith.constant 0 : index
    %63 = vector.load %arg10[%c4, %c0_24] : memref<36x256xf32, #tpu.memory_space<vmem>>, vector<4x256xf32>
    tpu.vector_store %arg10[%c4, %c0_24], %62 {strides = array<i32>} : memref<36x256xf32, #tpu.memory_space<vmem>>, vector<4x256xf32>,
    %c15_i32_25 = arith.constant 15 : i32
    %64 = vector.broadcast %c15_i32_25 : i32 to vector<1x256xi32>
    %65 = arith.cmpi slt, %44, %64 : vector<1x256xi32>
    %c15_i32_26 = arith.constant 15 : i32
    %66 = tpu.dynamic_rotate %41 by %c15_i32_26 dim 1 : vector<4x256xf32>, i32 -> vector<4x256xf32>
    %67 = arith.andi %48, %65 : vector<1x256xi1>
    %cst_27 = arith.constant 0.000000e+00 : f32
    %68 = vector.shape_cast %67 : vector<1x256xi1> to vector<1x256xi1>
    %69 = vector.broadcast %68 : vector<1x256xi1> to vector<4x256xi1>
    %70 = vector.broadcast %cst_27 : f32 to vector<4x256xf32>
    %71 = arith.select %69, %66, %70 : vector<4x256xi1>, vector<4x256xf32>
    %c8 = arith.constant 8 : index
    %c0_28 = arith.constant 0 : index
    %72 = vector.load %arg10[%c8, %c0_28] : memref<36x256xf32, #tpu.memory_space<vmem>>, vector<4x256xf32>
    tpu.vector_store %arg10[%c8, %c0_28], %71 {strides = array<i32>} : memref<36x256xf32, #tpu.memory_space<vmem>>, vector<4x256xf32>,
    %c1_i32_29 = arith.constant 1 : i32
    %73 = tpu.dynamic_rotate %41 by %c1_i32_29 dim 1 : vector<4x256xf32>, i32 -> vector<4x256xf32>
    %cst_30 = arith.constant 0.000000e+00 : f32
    %74 = vector.shape_cast %50 : vector<1x256xi1> to vector<1x256xi1>
    %75 = vector.broadcast %74 : vector<1x256xi1> to vector<4x256xi1>
    %76 = vector.broadcast %cst_30 : f32 to vector<4x256xf32>
    %77 = arith.select %75, %73, %76 : vector<4x256xi1>, vector<4x256xf32>
    %c12 = arith.constant 12 : index
    %c0_31 = arith.constant 0 : index
    %78 = vector.load %arg10[%c12, %c0_31] : memref<36x256xf32, #tpu.memory_space<vmem>>, vector<4x256xf32>
    tpu.vector_store %arg10[%c12, %c0_31], %77 {strides = array<i32>} : memref<36x256xf32, #tpu.memory_space<vmem>>, vector<4x256xf32>,
    %c16 = arith.constant 16 : index
    %c0_32 = arith.constant 0 : index
    %79 = vector.load %arg10[%c16, %c0_32] : memref<36x256xf32, #tpu.memory_space<vmem>>, vector<4x256xf32>
    tpu.vector_store %arg10[%c16, %c0_32], %41 {strides = array<i32>} : memref<36x256xf32, #tpu.memory_space<vmem>>, vector<4x256xf32>,
    %c255_i32 = arith.constant 255 : i32
    %80 = tpu.dynamic_rotate %41 by %c255_i32 dim 1 : vector<4x256xf32>, i32 -> vector<4x256xf32>
    %cst_33 = arith.constant 0.000000e+00 : f32
    %81 = vector.shape_cast %65 : vector<1x256xi1> to vector<1x256xi1>
    %82 = vector.broadcast %81 : vector<1x256xi1> to vector<4x256xi1>
    %83 = vector.broadcast %cst_33 : f32 to vector<4x256xf32>
    %84 = arith.select %82, %80, %83 : vector<4x256xi1>, vector<4x256xf32>
    %c20 = arith.constant 20 : index
    %c0_34 = arith.constant 0 : index
    %85 = vector.load %arg10[%c20, %c0_34] : memref<36x256xf32, #tpu.memory_space<vmem>>, vector<4x256xf32>
    tpu.vector_store %arg10[%c20, %c0_34], %84 {strides = array<i32>} : memref<36x256xf32, #tpu.memory_space<vmem>>, vector<4x256xf32>,
    %c15_i32_35 = arith.constant 15 : i32
    %86 = vector.broadcast %c15_i32_35 : i32 to vector<1x256xi32>
    %87 = arith.cmpi slt, %46, %86 : vector<1x256xi32>
    %c241_i32 = arith.constant 241 : i32
    %88 = tpu.dynamic_rotate %41 by %c241_i32 dim 1 : vector<4x256xf32>, i32 -> vector<4x256xf32>
    %89 = arith.andi %87, %50 : vector<1x256xi1>
    %cst_36 = arith.constant 0.000000e+00 : f32
    %90 = vector.shape_cast %89 : vector<1x256xi1> to vector<1x256xi1>
    %91 = vector.broadcast %90 : vector<1x256xi1> to vector<4x256xi1>
    %92 = vector.broadcast %cst_36 : f32 to vector<4x256xf32>
    %93 = arith.select %91, %88, %92 : vector<4x256xi1>, vector<4x256xf32>
    %c24 = arith.constant 24 : index
    %c0_37 = arith.constant 0 : index
    %94 = vector.load %arg10[%c24, %c0_37] : memref<36x256xf32, #tpu.memory_space<vmem>>, vector<4x256xf32>
    tpu.vector_store %arg10[%c24, %c0_37], %93 {strides = array<i32>} : memref<36x256xf32, #tpu.memory_space<vmem>>, vector<4x256xf32>,
    %c240_i32 = arith.constant 240 : i32
    %95 = tpu.dynamic_rotate %41 by %c240_i32 dim 1 : vector<4x256xf32>, i32 -> vector<4x256xf32>
    %cst_38 = arith.constant 0.000000e+00 : f32
    %96 = vector.shape_cast %87 : vector<1x256xi1> to vector<1x256xi1>
    %97 = vector.broadcast %96 : vector<1x256xi1> to vector<4x256xi1>
    %98 = vector.broadcast %cst_38 : f32 to vector<4x256xf32>
    %99 = arith.select %97, %95, %98 : vector<4x256xi1>, vector<4x256xf32>
    %c28 = arith.constant 28 : index
    %c0_39 = arith.constant 0 : index
    %100 = vector.load %arg10[%c28, %c0_39] : memref<36x256xf32, #tpu.memory_space<vmem>>, vector<4x256xf32>
    tpu.vector_store %arg10[%c28, %c0_39], %99 {strides = array<i32>} : memref<36x256xf32, #tpu.memory_space<vmem>>, vector<4x256xf32>,
    %c239_i32 = arith.constant 239 : i32
    %101 = tpu.dynamic_rotate %41 by %c239_i32 dim 1 : vector<4x256xf32>, i32 -> vector<4x256xf32>
    %102 = arith.andi %87, %65 : vector<1x256xi1>
    %cst_40 = arith.constant 0.000000e+00 : f32
    %103 = vector.shape_cast %102 : vector<1x256xi1> to vector<1x256xi1>
    %104 = vector.broadcast %103 : vector<1x256xi1> to vector<4x256xi1>
    %105 = vector.broadcast %cst_40 : f32 to vector<4x256xf32>
    %106 = arith.select %104, %101, %105 : vector<4x256xi1>, vector<4x256xf32>
    %c32 = arith.constant 32 : index
    %c0_41 = arith.constant 0 : index
    %107 = vector.load %arg10[%c32, %c0_41] : memref<36x256xf32, #tpu.memory_space<vmem>>, vector<4x256xf32>
    tpu.vector_store %arg10[%c32, %c0_41], %106 {strides = array<i32>} : memref<36x256xf32, #tpu.memory_space<vmem>>, vector<4x256xf32>,
    %c0_42 = arith.constant 0 : index
    %c0_43 = arith.constant 0 : index
    %108 = vector.load %arg2[%c0_42, %c0_43] : memref<8x36xf32, #tpu.memory_space<vmem>>, vector<8x36xf32>
    %c0_44 = arith.constant 0 : index
    %c0_45 = arith.constant 0 : index
    %109 = vector.load %arg10[%c0_44, %c0_45] : memref<36x256xf32, #tpu.memory_space<vmem>>, vector<36x256xf32>
    %cst_46 = arith.constant dense<0.000000e+00> : vector<8x256xf32>
    %110 = tpu.matmul %108, %109, %cst_46 {dimension_numbers = #tpu.dot_dimension_numbers<[1], [0], [0], [1], [0, 0, 1, 1], [], []>} : vector<8x36xf32>, vector<36x256xf32>, vector<8x256xf32> -> vector<8x256xf32>
    %111 = vector.broadcast %33 : f32 to vector<8x256xf32>
    %112 = arith.mulf %110, %111 : vector<8x256xf32>
    %c0_47 = arith.constant 0 : index
    %c0_48 = arith.constant 0 : index
    %113 = vector.load %arg6[%c0_47, %c0_48] : memref<8x1xf32, #tpu.memory_space<vmem>>, vector<8x1xf32>
    %114 = vector.broadcast %113 : vector<8x1xf32> to vector<8x256xf32>
    %115 = arith.addf %112, %114 : vector<8x256xf32>
    %c0_49 = arith.constant 0 : index
    %c0_50 = arith.constant 0 : index
    %c0_51 = arith.constant 0 : index
    %116 = vector.load %arg7[%c0_49, %c0_50, %c0_51] : memref<1x8x256xf32, #tpu.memory_space<vmem>>, vector<1x8x256xf32>
    %117 = vector.shape_cast %116 : vector<1x8x256xf32> to vector<8x256xf32>
    %118 = vector.shape_cast %115 : vector<8x256xf32> to vector<1x8x256xf32>
    tpu.vector_store %arg7[%c0_49, %c0_50, %c0_51], %118 {strides = array<i32>} : memref<1x8x256xf32, #tpu.memory_space<vmem>>, vector<1x8x256xf32>,
    return
  }
  func.func @transform_0(%arg0: i32) -> (i32, i32) {
    %c0_i32 = arith.constant 0 : i32
    %c0_i32_0 = arith.constant 0 : i32
    %c0_i32_1 = arith.constant 0 : i32
    return %c0_i32, %c0_i32_0 : i32, i32
  }
  func.func @transform_1(%arg0: i32) -> (i32, i32) {
    %c0_i32 = arith.constant 0 : i32
    %c0_i32_0 = arith.constant 0 : i32
    %c0_i32_1 = arith.constant 0 : i32
    return %c0_i32, %c0_i32_0 : i32, i32
  }
  func.func @transform_2(%arg0: i32) -> (i32, i32) {
    %c0_i32 = arith.constant 0 : i32
    %c0_i32_0 = arith.constant 0 : i32
    %c0_i32_1 = arith.constant 0 : i32
    return %c0_i32, %c0_i32_0 : i32, i32
  }
  func.func @transform_3(%arg0: i32) -> (i32, i32) {
    %c0_i32 = arith.constant 0 : i32
    %c0_i32_0 = arith.constant 0 : i32
    %c0_i32_1 = arith.constant 0 : i32
    return %c0_i32, %c0_i32_0 : i32, i32
  }
  func.func @transform_4(%arg0: i32) -> (i32, i32, i32) {
    %c0_i32 = arith.constant 0 : i32
    %c0_i32_0 = arith.constant 0 : i32
    %c0_i32_1 = arith.constant 0 : i32
    return %arg0, %c0_i32, %c0_i32_0 : i32, i32, i32
  }
  func.func @transform_5(%arg0: i32) -> (i32, i32) {
    %c0_i32 = arith.constant 0 : i32
    %c0_i32_0 = arith.constant 0 : i32
    %c0_i32_1 = arith.constant 0 : i32
    return %c0_i32, %c0_i32_0 : i32, i32
  }
  func.func @transform_6(%arg0: i32) -> (i32, i32, i32) {
    %c0_i32 = arith.constant 0 : i32
    %c0_i32_0 = arith.constant 0 : i32
    %c0_i32_1 = arith.constant 0 : i32
    return %arg0, %c0_i32, %c0_i32_0 : i32, i32, i32
  }
  func.func @transform_7(%arg0: i32) -> (i32, i32, i32) {
    %c0_i32 = arith.constant 0 : i32
    %c0_i32_0 = arith.constant 0 : i32
    %c0_i32_1 = arith.constant 0 : i32
    return %arg0, %c0_i32, %c0_i32_0 : i32, i32, i32
  }
  func.func @transform_8(%arg0: i32) -> (i32, i32, i32) {
    %c0_i32 = arith.constant 0 : i32
    %c0_i32_0 = arith.constant 0 : i32
    %c0_i32_1 = arith.constant 0 : i32
    return %arg0, %c0_i32, %c0_i32_0 : i32, i32, i32
  }
}

</mosaic_0001>

<bundles_post_ra>
// kernel: spectral_norm_conv2d.1
= control target key start
LH: loop header
LB: loop body
LE: loop exit
PB: predicated region body
PF: predicated region fallthrough
CT: control target
= control target key end

     0   :  { %s923_s27 = smov 0   ;;  %s1090_s0 = inlined_call_operand.vmem [shape: f32[8,36], index: 0, kind: input, shape index: {}]   ;;  %s1091_s1 = inlined_call_operand.vmem [shape: f32[8,36], index: 1, kind: input, shape index: {}]   ;;  %s1092_s2 = inlined_call_operand.vmem [shape: f32[8,1], index: 2, kind: input, shape index: {}]   ;;  %s1093_s3 = inlined_call_operand.vmem [shape: f32[1,36], index: 3, kind: input, shape index: {}]   ;;  %s1094_s4 = inlined_call_operand.vmem [shape: f32[2,4,256], index: 4, kind: input, shape index: {}]   ;;  %s1095_s5 = inlined_call_operand.vmem [shape: f32[8,1], index: 5, kind: input, shape index: {}]   ;;  %s1096_s6 = inlined_call_operand.vmem [shape: f32[2,8,256], index: 6, kind: output, shape index: {0}]   ;;  %s1097_s7 = inlined_call_operand.vmem [shape: f32[2,8,1], index: 7, kind: output, shape index: {1}]   ;;  %s1098_s8 = inlined_call_operand.vmem [shape: f32[2,1,36], index: 8, kind: output, shape index: {2}]  }
   0x1 LB: > { %s800_s3 = sadd.s32 4294967295, %s866_s27   ;;  %p804_p0 = scmp.ge.s32.totalorder %s866_s27, 1  ;;  %s866_s27 = sphi %s923_s27, %s19_s27  }
   0x2   : > { %p267_p1 = scmp.lt.s32.totalorder %s866_s27, 3 }
   0x4   : > { %p268_p2 = pnand %p804_p0, %p267_p1 }
   0x5   : > { %p308_p3 = scmp.lt.s32.totalorder (!%p268_p2), %s800_s3, 1  ;;  %s869_s20 = smov (!%p268_p2), 112  }
   0x6   : > { %271 = sbr.rel (%p268_p2) target bundleno = 1149 (0x47d), region = 44  ;;  %s870_s21 = smov (!%p268_p2), 127  }
   0x7   : > { %s871_s22 = smov (!%p268_p2), 111   ;;  %s872_s23 = smov (!%p268_p2), 113  }
   0x8   : > { %s873_s24 = smov (!%p268_p2), 1   ;;  %s874_s25 = smov (!%p268_p2), 16  }
   0x9   : > { %s875_s26 = smov (!%p268_p2), 15   ;;  %s876_s28 = smov (!%p268_p2), 17  }
   0xb   : > { %v326_v0 = vld [vmem:[%s1092_s2] sm:$0xff]  ;;  %v868_v1 = vmov 0   ;;  %vm333_vm0 = vcmask 293888   ;;  %vm342_vm1 = vcmask 286720   ;;  %s1116_s3 = smov (!%p308_p3, %s800_s3), 1  ;;  %vm371_vm4 = vcmask 7168  }
   0xc   : > { %847 = vset.pattern.permute.xlu0 %v868_v1  ;;  %848 = vset.pattern.permute.xlu1 %v868_v1  ;;  %v325_v2 = vld [vmem:[%s1090_s0] sm:$0xff]  ;;  %s815_s10 = sshll.u32 %s1116_s3, 3  ;;  %s324_s19 = scalar_lea.vmem %s1098_s8, %s1116_s3  ;;  %v412_v43 = vlaneseq }
   0xd   : > { %329 = vperm.xlu0 %847, %v326_v0   ;;  %s312_s13 = scalar_lea.vmem %s1094_s4, %s815_s10 }
   0xe   : > { %v411_v21 = vld [vmem:[%s312_s13] sm:$0xff]  ;;  %v962_v45 = vand.u32 127, %v412_v43 }
   0xf   : > { %504 = vst [vmem:[#allocation2 + $0x48] sm:$0xf] %v411_v21  ;;  %v424_v36 = vcombine.high %v411_v21, %v411_v21 }
  0x10   : > { %v965_v47 = vadd.s32 128, %v962_v45  ;;  %v417_v48 = vshra.s32 %v962_v45, 4  ;;  %vm550_vm5 = vcmp.lt.s32.totalorder %v962_v45, 112  ;;  %v415_v60 = vand.u32 15, %v962_v45 }
  0x11   : > { %505 = vst [vmem:[#allocation2 + $0x28] sm:$0xf] %v424_v36  ;;  %vm571_vm8 = vcmp.lt.s32.totalorder %v962_v45, 111  ;;  %vm510_vm11 = vcmp.lt.s32.totalorder %v962_v45, 127 }
  0x12   : > { %v418_v51 = vshra.s32 %v965_v47, 4  ;;  %vm972_vm6 = vcmp.lt.s32.totalorder %v417_v48, 15  ;;  %v416_v61 = vand.u32 15, %v965_v47  ;;  %vm989_vm9 = vcmp.lt.s32.totalorder %v415_v60, 15 }
  0x13   : > { %vm574_vm12 = vmand %vm972_vm6, %vm989_vm9  ;;  %vm1010_vm14 = vcmp.ge.s32.totalorder %v415_v60, 1 }
  0x14   : > { %vm980_vm7 = vcmp.lt.s32.totalorder %v418_v51, 15  ;;  %vm993_vm10 = vcmp.lt.s32.totalorder %v416_v61, 15  ;;  %vm1014_vm15 = vcmp.ge.s32.totalorder %v416_v61, 1 }
  0x15   : > { %vm575_vm13 = vmand %vm980_vm7, %vm993_vm10 }
  0x88   : > { %v330_v3 = vpop.permute.xlu0 %329 }
  0x89   : > { %v332_v4 = vmul.f32 %v330_v3, %v325_v2 }
  0x8b   : > { %v334_v5 = vsel %vm333_vm0, %v332_v4, 0.0 }
  0x8c   : > { %v335_v6 = vrot.slane %v334_v5, 4 }
  0x8e   : > { %v336_v7 = vadd.f32 %v335_v6, %v334_v5 }
  0x90   : > { %v337_v8 = vrot.slane %v336_v7, 2 }
  0x92   : > { %v338_v9 = vadd.f32 %v337_v8, %v336_v7 }
  0x94   : > { %v339_v10 = vrot.slane %v338_v9, 1 }
  0x96   : > { %v340_v11 = vadd.f32 %v339_v10, %v338_v9  ;;  %v877_v9 = vmov 0.0  }
  0x97   : > { %669 = vmatprep.mubr.f32.mxu0 %v877_v9 }
  0x98   : > { %v341_v12 = vmul.f32 %v340_v11, %v340_v11 }
  0x9a   : > { %v343_v13 = vsel %vm342_vm1, %v341_v12, 0.0 }
  0x9b   : > { %344 = vadd.xlane.f32.xlu0 %v343_v13 }
  0xb1   : > { %506 = vrot.lane.b32.xlu0 %v411_v21, %s870_s21 }
  0xb5   : > { %443 = vrot.lane.b32.xlu0 %v411_v21, %s874_s25 }
  0xb9   : > { %466 = vrot.lane.b32.xlu0 %v411_v21, %s875_s26 }
  0xbd   : > { %426 = vrot.lane.b32.xlu0 %v411_v21, %s876_s28 }
 0x124   : > { %v345_v14 = vpop.xlane.xlu0 %344 }
 0x125   : > { %v346_v15 = vrot.slane %v345_v14, 4 }
 0x127   : > { %v347_v16 = vadd.f32 %v346_v15, %v345_v14 }
 0x128   : > { %v507_v3 = vpop.permute.xlu0 %506 }
 0x129   : > { %v348_v17 = vrot.slane %v347_v16, 2 }
 0x12b   : > { %v349_v18 = vadd.f32 %v348_v17, %v347_v16 }
 0x12d   : > { %v350_v19 = vrot.slane %v349_v18, 1 }
 0x12f   : > { %v351_v20 = vadd.f32 %v350_v19, %v349_v18 }
 0x131   : > { %817 = vpush %v351_v20 }
 0x162   : > { %s818_s14 = spop %817 }
 0x163   : > { %v353_v22 = vstv %s818_s14 }
 0x164   : > { %850 = vrsqrt.f32 %v353_v22  ;;  %vm356_vm2 = vcmp.eq.f32.partialorder %v353_v22, inf  ;;  %v359_v25 = vand.u32 2147483648, %v353_v22  ;;  %vm358_vm3 = vcmp.eq.f32.partialorder %v353_v22, 0.0 }
 0x171   : > { %v851_v23 = vpop.eup %850 }
 0x172   : > { %v355_v24 = vmul.f32 %v851_v23, %v353_v22 }
 0x174   : > { %v357_v26 = vsel %vm356_vm2, %v353_v22, %v355_v24  ;;  %vm536_vm2 = vmand %vm972_vm6, %vm1010_vm14 }
 0x175   : > { %v360_v27 = vsel %vm358_vm3, %v359_v25, %v357_v26  ;;  %vm537_vm3 = vmand %vm980_vm7, %vm1014_vm15 }
 0x176   : > { %819 = vpush %v360_v27 }
 0x1a7   : > { %s820_s15 = spop %819 }
 0x1a8   : > { %s362_s16 = sadd.f32 1e-12, %s820_s15  ;;  %s321_s15 = scalar_lea.vmem %s1097_s7, %s815_s10 }
 0x1aa   : > { %v363_v28 = vstv %s362_s16 }
 0x1ab   : > { %852 = vrcp.f32 %v363_v28 }
 0x1b8   : > { %v853_v29 = vpop.eup %852 }
 0x1b9   : > { %v365_v30 = vmul.f32 %v853_v29, %v340_v11 }
 0x1bb   : > { %v366_v31 = vmul.f32 %v365_v30, %v325_v2  ;;  %410 = vst.msk [vmem:[%s324_s19] sm:$0x1] %vm342_vm1, %v365_v30  ;;  %vm533_vm1 = vcmp.lt.s32.totalorder %v962_v45, 113  ;;  %s816_s19 = sshll.u32 %s1116_s3, 4 }
 0x1bd   : > { %v367_v32 = vsel %vm333_vm0, %v366_v31, 0.0 }
 0x1be   : > { %368 = vadd.xlane.f32.xlu1 %v367_v32 }
 0x247   : > { %v957_v33 = vpop.xlane.xlu1 %368 }
 0x248   : > { %v370_v34 = vmul.f32 %v957_v33, %v957_v33 }
 0x24a   : > { %v372_v35 = vsel %vm371_vm4, %v370_v34, 0.0 }
 0x24b   : > { %373 = vadd.xlane.f32.xlu1 %v372_v35 }
 0x25c   : > { %546 = vrot.lane.b32.xlu1 %v411_v21, %s869_s20 }
 0x260   : > { %548 = vrot.lane.b32.xlu1 %v424_v36, %s869_s20 }
 0x264   : > { %567 = vrot.lane.b32.xlu1 %v411_v21, %s871_s22 }
 0x268   : > { %569 = vrot.lane.b32.xlu1 %v424_v36, %s871_s22  ;;  %s317_s22 = scalar_lea.vmem %s1096_s6, %s816_s19 }
 0x26c   : > { %508 = vrot.lane.b32.xlu1 %v424_v36, %s870_s21 }
 0x270   : > { %529 = vrot.lane.b32.xlu1 %v411_v21, %s872_s23 }
 0x274   : > { %531 = vrot.lane.b32.xlu1 %v424_v36, %s872_s23 }
 0x278   : > { %483 = vrot.lane.b32.xlu1 %v411_v21, %s873_s24 }
 0x27c   : > { %485 = vrot.lane.b32.xlu1 %v424_v36, %s873_s24 }
 0x280   : > { %445 = vrot.lane.b32.xlu1 %v424_v36, %s874_s25 }
 0x284   : > { %468 = vrot.lane.b32.xlu1 %v424_v36, %s875_s26 }
 0x288   : > { %428 = vrot.lane.b32.xlu1 %v424_v36, %s876_s28 }
 0x2d4   : > { %v374_v37 = vpop.xlane.xlu1 %373 }
 0x2d5   : > { %v375_v38 = vrot.slane %v374_v37, 4 }
 0x2d7   : > { %v376_v39 = vadd.f32 %v375_v38, %v374_v37  ;;  %v444_v37 = vpop.permute.xlu0 %443 }
 0x2d8   : > { %v547_v42 = vpop.permute.xlu1 %546 }
 0x2d9   : > { %v377_v40 = vrot.slane %v376_v39, 2 }
 0x2db   : > { %v378_v41 = vadd.f32 %v377_v40, %v376_v39  ;;  %v467_v47 = vpop.permute.xlu0 %466 }
 0x2dc   : > { %v549_v49 = vpop.permute.xlu1 %548 }
 0x2dd   : > { %v379_v44 = vrot.slane %v378_v41, 1  ;;  %v551_v50 = vsel %vm550_vm5, %v547_v42, %v549_v49  ;;  %v552_v53 = vsel %vm550_vm5, %v549_v49, %v547_v42  ;;  %vm598_vm5 = vcmask 1043456  }
 0x2de   : > { %v557_v54 = vsel %vm972_vm6, %v551_v50, 0.0  ;;  %v558_v57 = vsel %vm980_vm7, %v552_v53, 0.0  ;;  %vm487_vm6 = vcmp.lt.s32.totalorder %v962_v45, 1  ;;  %vm447_vm7 = vcmp.lt.s32.totalorder %v962_v45, 16 }
 0x2df   : > { %v380_v46 = vadd.f32 %v379_v44, %v378_v41  ;;  %v561_v56 = vrot.slane %v557_v54, 4  ;;  %v562_v58 = vrot.slane %v558_v57, 4  ;;  %v427_v55 = vpop.permute.xlu0 %426 }
 0x2e0   : > { %v568_v59 = vpop.permute.xlu1 %567 }
 0x2e1   : > { %821 = vpush %v380_v46  ;;  %565 = vst [vmem:[#allocation2 + $0x8] sm:$0xf0] %v561_v56 }
 0x2e2   : > { %566 = vst [vmem:[#allocation2 + $0x20] sm:$0xf0] %v562_v58 }
 0x2e4   : > { %v570_v62 = vpop.permute.xlu1 %569 }
 0x2e5   : > { %v572_v63 = vsel %vm571_vm8, %v568_v59, %v570_v62  ;;  %v573_v2 = vsel %vm571_vm8, %v570_v62, %v568_v59  ;;  %vm1035_vm8 = vcmp.ge.s32.totalorder %v417_v48, 1 }
 0x2e6   : > { %v580_v4 = vsel %vm574_vm12, %v572_v63, 0.0  ;;  %v581_v6 = vsel %vm575_vm13, %v573_v2, 0.0  ;;  %vm470_vm12 = vcmp.lt.s32.totalorder %v962_v45, 15  ;;  %vm473_vm13 = vmand %vm1035_vm8, %vm989_vm9 }
 0x2e7   : > { %582 = vst [vmem:[#allocation2 + $0x40] sm:$0xf] %v580_v4  ;;  %583 = vst [vmem:[#allocation2 + $0x38] sm:$0xf] %v581_v6 }
 0x2e8   : > { %v509_v5 = vpop.permute.xlu1 %508 }
 0x2e9   : > { %v511_v7 = vsel %vm510_vm11, %v507_v3, %v509_v5  ;;  %v512_v8 = vsel %vm510_vm11, %v509_v5, %v507_v3  ;;  %vm1041_vm11 = vcmp.ge.s32.totalorder %v418_v51, 1  ;;  %v584_v5 = vld [vmem:[%s1091_s1] sm:$0xff] }
 0x2ea   : > { %v517_v10 = vsel %vm989_vm9, %v511_v7, 0.0  ;;  %v518_v11 = vsel %vm993_vm10, %v512_v8, 0.0  ;;  %vm434_vm9 = vmand %vm1041_vm11, %vm1014_vm15 }
 0x2eb   : > { %v521_v13 = vrot.slane %v517_v10, 4  ;;  %v522_v14 = vrot.slane %v518_v11, 4  ;;  %v679_v11 = vld [vmem:[%s1095_s5] sm:$0xff] }
 0x2ec   : > { %v530_v15 = vpop.permute.xlu1 %529  ;;  %682 = vperm.xlu1 %848, %v679_v11  }
 0x2ed   : > { %525 = vst [vmem:[#allocation2 + $0x48] sm:$0xf0] %v521_v13  ;;  %526 = vst [vmem:[#allocation2 + $0x28] sm:$0xf0] %v522_v14 }
 0x2ee   : > { %v593_v18 = vld [vmem:[#allocation2 + $0x40] sm:$0xf]  ;;  %v594_v21 = vld [vmem:[#allocation2 + $0x38] sm:$0xf] }
 0x2ef   : > { %810 = vmatprep.subr.msk.mxu0 %vm598_vm5, %v594_v21 }
 0x2f0   : > { %v532_v17 = vpop.permute.xlu1 %531  ;;  %811 = vmatpush1.msk.msra.mxu0 %vm598_vm5, %v593_v18 }
 0x2f1   : > { %v534_v19 = vsel %vm533_vm1, %v530_v15, %v532_v17  ;;  %v535_v20 = vsel %vm533_vm1, %v532_v17, %v530_v15  ;;  %vm474_vm1 = vmand %vm1041_vm11, %vm993_vm10 }
 0x2f2   : > { %v542_v22 = vsel %vm536_vm2, %v534_v19, 0.0  ;;  %v543_v23 = vsel %vm537_vm3, %v535_v20, 0.0  ;;  %vm430_vm2 = vcmp.lt.s32.totalorder %v962_v45, 17  ;;  %vm433_vm3 = vmand %vm1035_vm8, %vm1010_vm14 }
 0x2f3   : > { %544 = vst [vmem:[#allocation2 + $0x8] sm:$0xf] %v542_v22  ;;  %545 = vst [vmem:[#allocation2 + $0x20] sm:$0xf] %v543_v23 }
 0x2f4   : > { %v590_v26 = vld [vmem:[#allocation2 + $0x28] sm:$0xff]  ;;  %v484_v28 = vpop.permute.xlu1 %483 }
 0x2f5   : > { %v589_v27 = vld [vmem:[#allocation2 + $0x48] sm:$0xff] }
 0x2f8   : > { %v486_v29 = vpop.permute.xlu1 %485 }
 0x2f9   : > { %v488_v30 = vsel %vm487_vm6, %v484_v28, %v486_v29  ;;  %v489_v31 = vsel %vm487_vm6, %v486_v29, %v484_v28 }
 0x2fa   : > { %v592_v24 = vld [vmem:[#allocation2 + $0x20] sm:$0xff]  ;;  %v591_v25 = vld [vmem:[#allocation2 + $0x8] sm:$0xff]  ;;  %v494_v32 = vsel %vm1010_vm14, %v489_v31, 0.0  ;;  %v495_v34 = vsel %vm1014_vm15, %v488_v30, 0.0 }
 0x2fb   : > { %629 = vmatprep.subr.mxu0 %v592_v24  ;;  %v498_v35 = vrot.slane %v494_v32, 4  ;;  %v499_v36 = vrot.slane %v495_v34, 4 }
 0x2fc   : > { %630 = vmatpush1.msra.mxu0 %v591_v25  ;;  %v446_v38 = vpop.permute.xlu1 %445 }
 0x2fd   : > { %631 = vmatprep.subr.mxu0 %v590_v26  ;;  %502 = vst [vmem:[#allocation2 + $0x18] sm:$0xf0] %v498_v35  ;;  %503 = vst [vmem:[#allocation2 + $0x10] sm:$0xf0] %v499_v36  ;;  %v448_v41 = vsel %vm447_vm7, %v444_v37, %v446_v38  ;;  %v449_v42 = vsel %vm447_vm7, %v446_v38, %v444_v37 }
 0x2fe   : > { %632 = vmatpush1.msra.mxu0 %v589_v27  ;;  %v454_v43 = vsel %vm1035_vm8, %v449_v42, 0.0  ;;  %v455_v44 = vsel %vm1041_vm11, %v448_v41, 0.0 }
 0x2ff   : > { %v458_v46 = vrot.slane %v454_v43, 4  ;;  %v459_v48 = vrot.slane %v455_v44, 4 }
 0x300   : > { %v469_v50 = vpop.permute.xlu1 %468 }
 0x301   : > { %462 = vst [vmem:[#allocation2 + $0x30] sm:$0xf0] %v458_v46  ;;  %463 = vst [vmem:[#allocation2] sm:$0xf0] %v459_v48  ;;  %v471_v51 = vsel %vm470_vm12, %v467_v47, %v469_v50  ;;  %v472_v52 = vsel %vm470_vm12, %v469_v50, %v467_v47 }
 0x302   : > { %v479_v53 = vsel %vm473_vm13, %v472_v52, 0.0  ;;  %v480_v54 = vsel %vm474_vm1, %v471_v51, 0.0 }
 0x303   : > { %481 = vst [vmem:[#allocation2 + $0x18] sm:$0xf] %v479_v53  ;;  %482 = vst [vmem:[#allocation2 + $0x10] sm:$0xf] %v480_v54 }
 0x304   : > { %v429_v56 = vpop.permute.xlu1 %428 }
 0x305   : > { %v431_v57 = vsel %vm430_vm2, %v427_v55, %v429_v56  ;;  %v432_v58 = vsel %vm430_vm2, %v429_v56, %v427_v55 }
 0x306   : > { %v439_v59 = vsel %vm433_vm3, %v432_v58, 0.0  ;;  %v440_v60 = vsel %vm434_vm9, %v431_v57, 0.0 }
 0x307   : > { %441 = vst [vmem:[#allocation2 + $0x30] sm:$0xf] %v439_v59  ;;  %442 = vst [vmem:[#allocation2] sm:$0xf] %v440_v60 }
 0x30a   : > { %v588_v63 = vld [vmem:[#allocation2 + $0x10] sm:$0xff]  ;;  %v587_v0 = vld [vmem:[#allocation2 + $0x18] sm:$0xff] }
 0x30b   : > { %633 = vmatprep.subr.mxu0 %v588_v63 }
 0x30c   : > { %634 = vmatpush1.msra.mxu0 %v587_v0 }
 0x30e   : > { %v586_v3 = vld [vmem:[#allocation2] sm:$0xff]  ;;  %v585_v4 = vld [vmem:[#allocation2 + $0x30] sm:$0xff] }
 0x30f   : > { %635 = vmatprep.subr.mxu0 %v586_v3 }
 0x310   : > { %636 = vmatpush1.msra.mxu0 %v585_v4 }
 0x311   : > { %812 = vmatmul.mubr.msk.f32.vlgmr.msra.gmra.mxu0 %vm333_vm0, %v584_v5 }
 0x312   : > { %s822_s29 = spop %821 }
 0x313   : > { %v382_v49 = vstv %s822_s29 }
 0x314   : > { %854 = vrsqrt.f32 %v382_v49  ;;  %vm385_vm10 = vcmp.eq.f32.partialorder %v382_v49, inf  ;;  %v388_v62 = vand.u32 2147483648, %v382_v49  ;;  %vm387_vm14 = vcmp.eq.f32.partialorder %v382_v49, 0.0 }
 0x321   : > { %v855_v45 = vpop.eup %854 }
 0x322   : > { %v384_v61 = vmul.f32 %v855_v45, %v382_v49 }
 0x324   : > { %v386_v1 = vsel %vm385_vm10, %v382_v49, %v384_v61 }
 0x325   : > { %v389_v2 = vsel %vm387_vm14, %v388_v62, %v386_v1 }
 0x326   : > { %823 = vpush %v389_v2 }
 0x357   : > { %s824_s11 = spop %823 }
 0x358   : > { %s391_s12 = sadd.f32 1e-12, %s824_s11 }
 0x35a   : > { %v392_v6 = vstv %s391_s12 }
 0x35b   : > { %856 = vrcp.f32 %v392_v6 }
 0x367   : > { %v683_v23 = vpop.permute.xlu1 %682 }
 0x368   : > { %v857_v7 = vpop.eup %856 }
 0x369   : > { %v394_v8 = vmul.f32 %v857_v7, %v957_v33 }
 0x36b   : > { %v395_v9 = vmul.f32 %v394_v8, %v957_v33  ;;  %409 = vst.msk [vmem:[%s321_s15] sm:$0xff] %vm371_vm4, %v394_v8 }
 0x36d   : > { %v396_v10 = vsel %vm371_vm4, %v395_v9, 0.0 }
 0x36e   : > { %397 = vadd.xlane.f32.xlu0 %v396_v10 }
 0x3d1   : > { %v671_v20 = vpop.f32.mrf.mxu0 }
 0x3d3   : > { %v673_v21 = vpop.f32.mrf.mxu0 }
 0x3f7   : > { %v398_v12 = vpop.xlane.xlu0 %397 }
 0x3f8   : > { %v399_v13 = vrot.slane %v398_v12, 4 }
 0x3fa   : > { %v400_v14 = vadd.f32 %v399_v13, %v398_v12 }
 0x3fc   : > { %v401_v15 = vrot.slane %v400_v14, 2 }
 0x3fe   : > { %v402_v16 = vadd.f32 %v401_v15, %v400_v14 }
 0x400   : > { %v403_v17 = vrot.slane %v402_v16, 1 }
 0x402   : > { %v404_v18 = vadd.f32 %v403_v17, %v402_v16 }
 0x404   : > { %825 = vpush %v404_v18 }
 0x435   : > { %s826_s10 = spop %825 }
 0x436   : > { %v406_v33 = vstv %s826_s10 }
 0x437   : > { %858 = vrcp.f32 %v406_v33 }
 0x444   : > { %v859_v19 = vpop.eup %858 }
 0x445   : > { %827 = vpush %v859_v19 }
 0x476   : > { %s828_s18 = spop %827 }
 0x477   : > { %v676_v22 = vstv %s828_s18 }
 0x478   : > { %v677_v24 = vmul.f32 %v676_v22, %v671_v20  ;;  %v678_v25 = vmul.f32 %v676_v22, %v673_v21 }
 0x47a   : > { %v685_v26 = vadd.f32 %v683_v23, %v677_v24  ;;  %v686_v27 = vadd.f32 %v683_v23, %v678_v25 }
 0x47c   : > { %687 = vst [vmem:[%s317_s22] sm:$0xff] %v685_v26  ;;  %688 = vst [vmem:[%s317_s22 + $0x8] sm:$0xff] %v686_v27 }
 0x47d PF: > { %s19_s27 = sadd.s32 1, %s866_s27  }
 0x47e   : > { %p16_p4 = scmp.ge.s32.totalorder %s19_s27, 4  }
 0x480   :  { %18 = sbr.rel (!%p16_p4) target bundleno = 1 (0x1), region = 98 }

</bundles_post_ra>
